<compile_context>
chip_gen: v7x
topology: tpu7x:2x2x1
jax: 0.10.0
libtpu: 0.0.40
codegen_flags: <defaults>
</compile_context>

<pallas_src>
import jax
import jax.numpy as jnp
from jax import lax
from jax.experimental import pallas as pl
from jax.experimental.pallas import tpu as pltpu


def _round_up(x, m):
    return (x + m - 1) // m * m


def _pad2(a, rows, cols):
    return jnp.pad(a, ((0, rows - a.shape[0]), (0, cols - a.shape[1])))


def _edge_norm(edge_index, num_nodes):
    """Symmetric degree norm, matching the torch module (inf -> 0)."""
    head, tail = edge_index[0], edge_index[1]
    deg = jnp.zeros((num_nodes,), jnp.float32).at[head].add(1.0)
    deg_inv = jnp.where(deg > 0, jnp.where(deg > 0, deg, 1.0) ** -0.5, 0.0)
    return deg_inv[head] * deg_inv[tail]


# --------------------------------------------------------------------------- #
# Pallas kernel: sorted-edge segment-sum (in-kernel one-hot indicator -> MXU,
# f32 accumulate) + bf16 projection / bias-add / tanh epilogue.
# Grid = (node_tile i ["parallel"], local edge tile e ["arbitrary"]).
# --------------------------------------------------------------------------- #
def _compgcn_segsum_kernel(meta_ref,
                           comp_in_ref, head_in_ref,
                           comp_out_ref, head_out_ref,
                           bias_ref, w_in_ref, w_out_ref,
                           out_ref,
                           acc_in_ref, acc_out_ref):
    f32, bf16 = jnp.float32, jnp.bfloat16
    i = pl.program_id(0)
    e = pl.program_id(1)
    tn = acc_in_ref.shape[0]
    te = comp_in_ref.shape[0]

    @pl.when(e == 0)
    def _init():
        acc_in_ref[...] = jnp.zeros_like(acc_in_ref)
        acc_out_ref[...] = jnp.zeros_like(acc_out_ref)

    # Global node id of every row of this node tile, broadcast along the edge
    # tile.  Builds the (tn, te) scatter indicator in VMEM from O(te) head ids
    # — no O(N*E) indicator ever touches HBM.  Spill-over / padded edges
    # (head outside this tile, or -1) produce all-zero columns.
    row_ids = i * tn + lax.broadcasted_iota(jnp.int32, (tn, te), 0)

    @pl.when(e < meta_ref[i, 1])           # this node tile still owns in-edge tiles
    def _in_edges():
        ind = jnp.where(row_ids == head_in_ref[...], 1.0, 0.0).astype(bf16)
        acc_in_ref[...] += jnp.dot(ind, comp_in_ref[...],
                                   preferred_element_type=f32)

    @pl.when(e < meta_ref[i, 3])           # ... out-edge tiles
    def _out_edges():
        ind = jnp.where(row_ids == head_out_ref[...], 1.0, 0.0).astype(bf16)
        acc_out_ref[...] += jnp.dot(ind, comp_out_ref[...],
                                    preferred_element_type=f32)

    @pl.when(e == pl.num_programs(1) - 1)
    def _finalize():
        # 1/3 scale pre-folded into bf16 w_in / w_out; self-loop term arrives
        # pre-projected as an f32 bias block.
        res = (jnp.dot(acc_in_ref[...].astype(bf16), w_in_ref[...],
                       preferred_element_type=f32)
               + jnp.dot(acc_out_ref[...].astype(bf16), w_out_ref[...],
                         preferred_element_type=f32)
               + bias_ref[...])
        out_ref[...] = jnp.tanh(res)


def compgcn_basis_forward(params, nodes_features, edge_index, edge_type,
                          *, node_tile=1024, edge_tile=512):
    f32, bf16 = jnp.float32, jnp.bfloat16
    x = nodes_features.astype(f32)
    N, Cin = x.shape
    Cout = params["w_in"].shape[1]
    E = edge_index.shape[1] // 2

    # ---- tiny relation-embedding math & out_2 stay in plain JAX -------------
    rel_emb = jnp.concatenate(
        [params["rel_weight"].astype(f32) @ params["basis_vector"].astype(f32),
         params["loop_rel"].astype(f32)], axis=0)                 # (2R+1, Cin)
    out2 = rel_emb @ params["weight_rel"].astype(f32)             # (2R+1, Cout)

    in_idx, out_idx = edge_index[:, :E], edge_index[:, E:]
    in_type, out_type = edge_type[:E], edge_type[E:]

    # ---- self-loop term hoisted out of the kernel (plain-JAX matmul) --------
    loop_bias = ((x - rel_emb[-1]) @ params["w_loop"].astype(f32)) * (1.0 / 3.0)

    # ---- tiling: lane-dense 128 multiples; Cin -> 256 mult when >128 so the
    # per-step matmul fills the 256-wide MXU on v6e / v7x ---------------------
    cin_p = _round_up(Cin, 128) if Cin <= 128 else _round_up(Cin, 256)
    cout_p = _round_up(Cout, 128)
    # On v7x pick node_tile so n_p // tn >= 2 to keep both TensorCores busy.
    tn = min(node_tile, _round_up(N, 8))
    te = min(edge_tile, _round_up(E, 128))
    n_p = _round_up(N, tn)
    e_p = _round_up(E, te)
    num_node_tiles = n_p // tn
    num_edge_tiles = e_p // te

    def prep_direction(idx, typ):
        """Sort one edge direction by head; return bf16 messages (norm folded),
        head ids, and per-node-tile (start_edge_tile, num_edge_tiles)."""
        head, tail = idx[0], idx[1]
        norm = _edge_norm(idx, N)
        order = jnp.argsort(head)
        head_s = head[order].astype(jnp.int32)
        comp_s = (x[tail[order]] - rel_emb[typ[order]]) * norm[order][:, None]
        bounds = jnp.searchsorted(head_s, jnp.arange(num_node_tiles + 1) * tn)
        start_e, end_e = bounds[:-1], bounds[1:]
        start_t = start_e // te
        end_t = jnp.where(end_e > start_e, (end_e - 1) // te + 1, start_t)
        ntiles = (end_t - start_t).astype(jnp.int32)
        comp_p = _pad2(comp_s, e_p, cin_p).astype(bf16)
        head_p = jnp.full((1, e_p), -1, jnp.int32).at[0, :E].set(head_s)
        return comp_p, head_p, start_t.astype(jnp.int32), ntiles

    comp_in_p, head_in_p, start_in, nt_in = prep_direction(in_idx, in_type)
    comp_out_p, head_out_p, start_out, nt_out = prep_direction(out_idx, out_type)

    # Scalar-prefetch table: [start_tile_in, ntiles_in, start_tile_out, ntiles_out]
    meta = jnp.stack([start_in, nt_in, start_out, nt_out], axis=1).astype(jnp.int32)

    # Edge axis only spans the tiles a node tile actually owns.
    max_local = max(int(jnp.max(nt_in)), int(jnp.max(nt_out)), 1)

    third = jnp.float32(1.0 / 3.0)
    w_in_p = _pad2(params["w_in"].astype(f32) * third, cin_p, cout_p).astype(bf16)
    w_out_p = _pad2(params["w_out"].astype(f32) * third, cin_p, cout_p).astype(bf16)
    bias_p = _pad2(loop_bias, n_p, cout_p)

    def edge_block(start_col, count_col, transposed):
        def imap(i, e, meta_ref):
            start = meta_ref[i, start_col]
            cnt = meta_ref[i, count_col]
            local = jnp.minimum(e, jnp.maximum(cnt - 1, 0))   # clamp -> no re-DMA past range
            t = jnp.minimum(start + local, num_edge_tiles - 1)
            return (0, t) if transposed else (t, 0)
        return imap

    grid = (num_node_tiles, max_local)
    out_p = pl.pallas_call(
        _compgcn_segsum_kernel,
        out_shape=jax.ShapeDtypeStruct((n_p, cout_p), f32),
        grid_spec=pltpu.PrefetchScalarGridSpec(
            num_scalar_prefetch=1,
            grid=grid,
            in_specs=[
                pl.BlockSpec((te, cin_p), edge_block(0, 1, False)),     # comp_in
                pl.BlockSpec((1, te), edge_block(0, 1, True)),          # head_in
                pl.BlockSpec((te, cin_p), edge_block(2, 3, False)),     # comp_out
                pl.BlockSpec((1, te), edge_block(2, 3, True)),          # head_out
                pl.BlockSpec((tn, cout_p), lambda i, e, m: (i, 0)),     # loop bias
                pl.BlockSpec((cin_p, cout_p), lambda i, e, m: (0, 0)),  # w_in / 3
                pl.BlockSpec((cin_p, cout_p), lambda i, e, m: (0, 0)),  # w_out / 3
            ],
            out_specs=pl.BlockSpec((tn, cout_p), lambda i, e, m: (i, 0)),
            scratch_shapes=[pltpu.VMEM((tn, cin_p), f32),
                            pltpu.VMEM((tn, cin_p), f32)],
        ),
        compiler_params=pltpu.CompilerParams(
            dimension_semantics=("parallel", "arbitrary"),
            vmem_limit_bytes=48 * 1024 * 1024,   # under v7x's 64 MiB physical
        ),
    )(meta, comp_in_p, head_in_p, comp_out_p, head_out_p, bias_p, w_in_p, w_out_p)

    return out_p[:N, :Cout], out2


# --------------------------------------------------------------------------- #
# Pure-JAX f32 reference of the PyTorch forward (eval mode), for checking.
# --------------------------------------------------------------------------- #
def reference_forward(params, x, edge_index, edge_type):
    x = x.astype(jnp.float32)
    N = x.shape[0]
    rel_emb = jnp.concatenate(
        [params["rel_weight"] @ params["basis_vector"], params["loop_rel"]], axis=0)
    E = edge_index.shape[1] // 2

    def prop(idx, typ, w, norm):
        msg = (x[idx[1]] - rel_emb[typ]) @ w
        if norm is not None:
            msg = msg * norm[:, None]
        return jnp.zeros((N, w.shape[1]), jnp.float32).at[idx[0]].add(msg)

    in_idx, out_idx = edge_index[:, :E], edge_index[:, E:]
    in_t, out_t = edge_type[:E], edge_type[E:]
    loop_idx = jnp.stack([jnp.arange(N), jnp.arange(N)])
    loop_t = jnp.full((N,), rel_emb.shape[0] - 1, dtype=jnp.int32)

    in_res = prop(in_idx, in_t, params["w_in"], _edge_norm(in_idx, N))
    out_res = prop(out_idx, out_t, params["w_out"], _edge_norm(out_idx, N))
    loop_res = prop(loop_idx, loop_t, params["w_loop"], None)
    out = jnp.tanh((in_res + out_res + loop_res) / 3.0)
    out2 = rel_emb @ params["weight_rel"]
    return out, out2


if __name__ == "__main__":
    # Small, deterministic synthetic problem.
    in_channels, out_channels = 16, 32
    num_relations, num_basis = 4, 3
    num_nodes, num_edges = 12, 10          # edge_index has 2*num_edges columns

    key = jax.random.PRNGKey(0)
    ks = jax.random.split(key, 12)

    def xavier(k, shape):
        fan_in, fan_out = shape[0], shape[1]
        lim = (6.0 / (fan_in + fan_out)) ** 0.5
        return jax.random.uniform(k, shape, jnp.float32, -lim, lim)

    params = {
        "basis_vector": xavier(ks[0], (num_basis, in_channels)),
        "rel_weight": xavier(ks[1], (num_relations * 2, num_basis)),
        "weight_rel": xavier(ks[2], (in_channels, out_channels)),
        "loop_rel": xavier(ks[3], (1, in_channels)),
        "w_in": xavier(ks[4], (in_channels, out_channels)),
        "w_out": xavier(ks[5], (in_channels, out_channels)),
        "w_loop": xavier(ks[6], (in_channels, out_channels)),
    }

    nodes_features = jax.random.normal(ks[7], (num_nodes, in_channels), jnp.float32)
    heads = jax.random.randint(ks[8], (2 * num_edges,), 0, num_nodes)
    tails = jax.random.randint(ks[9], (2 * num_edges,), 0, num_nodes)
    edge_index = jnp.stack([heads, tails]).astype(jnp.int32)          # (2, 2E)
    edge_type = jnp.concatenate([
        jax.random.randint(ks[10], (num_edges,), 0, num_relations),
        jax.random.randint(ks[11], (num_edges,), 0, num_relations) + num_relations,
    ]).astype(jnp.int32)                                              # (2E,)

    out, out2 = compgcn_basis_forward(params, nodes_features, edge_index, edge_type)
    jax.block_until_ready((out, out2))

    ref_out, ref_out2 = reference_forward(params, nodes_features, edge_index, edge_type)
    assert out.shape == (num_nodes, out_channels)
    assert out2.shape == (2 * num_relations + 1, out_channels)
    # Kernel path uses bf16 messages / indicator / projection (matching the
    # module's amp.autocast) with f32 accumulation -> bf16-level tolerance.
    assert jnp.allclose(out, ref_out, atol=5e-2, rtol=5e-2)
    assert jnp.allclose(out2, ref_out2, atol=1e-5, rtol=1e-4)

    print("KERNEL_OK")
</pallas_src>

<mosaic_0001>
module attributes {stable_mosaic.version = 11 : i64} {
  func.func @_compgcn_segsum_kernel(%arg0: i32, %arg1: i32, %arg2: memref<1x4xi32, #tpu.memory_space<smem>>, %arg3: memref<128x128xbf16, #tpu.memory_space<vmem>>, %arg4: memref<1x128xi32, #tpu.memory_space<vmem>>, %arg5: memref<128x128xbf16, #tpu.memory_space<vmem>>, %arg6: memref<1x128xi32, #tpu.memory_space<vmem>>, %arg7: memref<16x128xf32, #tpu.memory_space<vmem>>, %arg8: memref<128x128xbf16, #tpu.memory_space<vmem>>, %arg9: memref<128x128xbf16, #tpu.memory_space<vmem>>, %arg10: memref<16x128xf32, #tpu.memory_space<vmem>>, %arg11: memref<16x128xf32, #tpu.memory_space<vmem>>, %arg12: memref<16x128xf32, #tpu.memory_space<vmem>>) attributes {dimension_semantics = [#tpu.dimension_semantics<parallel>, #tpu.dimension_semantics<arbitrary>], iteration_bounds = array<i64: 1, 1>, scalar_prefetch = 1 : i64, scratch_operands = 2 : i64, tpu.core_type = #tpu.core_type<tc>, window_params = [{transform_indices = @transform_0, window_bounds = array<i64: 128, 128>}, {transform_indices = @transform_1, window_bounds = array<i64: 1, 128>}, {transform_indices = @transform_2, window_bounds = array<i64: 128, 128>}, {transform_indices = @transform_3, window_bounds = array<i64: 1, 128>}, {transform_indices = @transform_4, window_bounds = array<i64: 16, 128>}, {pipeline_mode = #tpu.pipeline_mode<synchronous>, transform_indices = @transform_5, window_bounds = array<i64: 128, 128>}, {pipeline_mode = #tpu.pipeline_mode<synchronous>, transform_indices = @transform_6, window_bounds = array<i64: 128, 128>}, {transform_indices = @transform_7, window_bounds = array<i64: 16, 128>}]} {
    %c0_i32 = arith.constant 0 : i32
    %0 = arith.cmpi eq, %arg1, %c0_i32 : i32
    %1 = arith.extui %0 : i1 to i32
    %c0_i32_0 = arith.constant 0 : i32
    %2 = arith.cmpi ne, %1, %c0_i32_0 : i32
    scf.if %2 {
      %cst = arith.constant 0.000000e+00 : f32
      %20 = vector.broadcast %cst : f32 to vector<16x128xf32>
      %c0 = arith.constant 0 : index
      %c0_5 = arith.constant 0 : index
      %21 = vector.load %arg11[%c0, %c0_5] : memref<16x128xf32, #tpu.memory_space<vmem>>, vector<16x128xf32>
      tpu.vector_store %arg11[%c0, %c0_5], %20 {strides = array<i32>} : memref<16x128xf32, #tpu.memory_space<vmem>>, vector<16x128xf32>,
      %cst_6 = arith.constant 0.000000e+00 : f32
      %22 = vector.broadcast %cst_6 : f32 to vector<16x128xf32>
      %c0_7 = arith.constant 0 : index
      %c0_8 = arith.constant 0 : index
      %23 = vector.load %arg12[%c0_7, %c0_8] : memref<16x128xf32, #tpu.memory_space<vmem>>, vector<16x128xf32>
      tpu.vector_store %arg12[%c0_7, %c0_8], %22 {strides = array<i32>} : memref<16x128xf32, #tpu.memory_space<vmem>>, vector<16x128xf32>,
    } else {
    }
    %c16_i32 = arith.constant 16 : i32
    %3 = arith.muli %arg0, %c16_i32 : i32
    %4 = tpu.iota {dimensions = array<i32: 0>} : vector<16x128xi32>
    %5 = vector.broadcast %3 : i32 to vector<16x128xi32>
    %6 = arith.addi %5, %4 : vector<16x128xi32>
    %7 = arith.index_cast %arg0 : i32 to index
    %c1 = arith.constant 1 : index
    %8 = memref.load %arg2[%7, %c1] : memref<1x4xi32, #tpu.memory_space<smem>>
    %9 = arith.cmpi slt, %arg1, %8 : i32
    %10 = arith.extui %9 : i1 to i32
    %c0_i32_1 = arith.constant 0 : i32
    %11 = arith.cmpi ne, %10, %c0_i32_1 : i32
    scf.if %11 {
      %c0 = arith.constant 0 : index
      %c0_5 = arith.constant 0 : index
      %20 = vector.load %arg4[%c0, %c0_5] : memref<1x128xi32, #tpu.memory_space<vmem>>, vector<1x128xi32>
      %21 = vector.broadcast %20 : vector<1x128xi32> to vector<16x128xi32>
      %22 = arith.cmpi eq, %6, %21 : vector<16x128xi32>
      %cst = arith.constant 1.000000e+00 : f32
      %cst_6 = arith.constant 0.000000e+00 : f32
      %23 = vector.broadcast %cst : f32 to vector<16x128xf32>
      %24 = vector.broadcast %cst_6 : f32 to vector<16x128xf32>
      %25 = arith.select %22, %23, %24 : vector<16x128xi1>, vector<16x128xf32>
      %26 = arith.truncf %25 : vector<16x128xf32> to vector<16x128xbf16>
      %c0_7 = arith.constant 0 : index
      %c0_8 = arith.constant 0 : index
      %27 = vector.load %arg11[%c0_7, %c0_8] : memref<16x128xf32, #tpu.memory_space<vmem>>, vector<16x128xf32>
      %c0_9 = arith.constant 0 : index
      %c0_10 = arith.constant 0 : index
      %28 = vector.load %arg3[%c0_9, %c0_10] : memref<128x128xbf16, #tpu.memory_space<vmem>>, vector<128x128xbf16>
      %cst_11 = arith.constant dense<0.000000e+00> : vector<16x128xf32>
      %29 = tpu.matmul %26, %28, %cst_11 {dimension_numbers = #tpu.dot_dimension_numbers<[1], [0], [0], [1], [0, 0, 1, 1], [], []>} : vector<16x128xbf16>, vector<128x128xbf16>, vector<16x128xf32> -> vector<16x128xf32>
      %30 = arith.addf %27, %29 : vector<16x128xf32>
      %c0_12 = arith.constant 0 : index
      %c0_13 = arith.constant 0 : index
      %31 = vector.load %arg11[%c0_12, %c0_13] : memref<16x128xf32, #tpu.memory_space<vmem>>, vector<16x128xf32>
      tpu.vector_store %arg11[%c0_12, %c0_13], %30 {strides = array<i32>} : memref<16x128xf32, #tpu.memory_space<vmem>>, vector<16x128xf32>,
    } else {
    }
    %12 = arith.index_cast %arg0 : i32 to index
    %c3 = arith.constant 3 : index
    %13 = memref.load %arg2[%12, %c3] : memref<1x4xi32, #tpu.memory_space<smem>>
    %14 = arith.cmpi slt, %arg1, %13 : i32
    %15 = arith.extui %14 : i1 to i32
    %c0_i32_2 = arith.constant 0 : i32
    %16 = arith.cmpi ne, %15, %c0_i32_2 : i32
    scf.if %16 {
      %c0 = arith.constant 0 : index
      %c0_5 = arith.constant 0 : index
      %20 = vector.load %arg6[%c0, %c0_5] : memref<1x128xi32, #tpu.memory_space<vmem>>, vector<1x128xi32>
      %21 = vector.broadcast %20 : vector<1x128xi32> to vector<16x128xi32>
      %22 = arith.cmpi eq, %6, %21 : vector<16x128xi32>
      %cst = arith.constant 1.000000e+00 : f32
      %cst_6 = arith.constant 0.000000e+00 : f32
      %23 = vector.broadcast %cst : f32 to vector<16x128xf32>
      %24 = vector.broadcast %cst_6 : f32 to vector<16x128xf32>
      %25 = arith.select %22, %23, %24 : vector<16x128xi1>, vector<16x128xf32>
      %26 = arith.truncf %25 : vector<16x128xf32> to vector<16x128xbf16>
      %c0_7 = arith.constant 0 : index
      %c0_8 = arith.constant 0 : index
      %27 = vector.load %arg12[%c0_7, %c0_8] : memref<16x128xf32, #tpu.memory_space<vmem>>, vector<16x128xf32>
      %c0_9 = arith.constant 0 : index
      %c0_10 = arith.constant 0 : index
      %28 = vector.load %arg5[%c0_9, %c0_10] : memref<128x128xbf16, #tpu.memory_space<vmem>>, vector<128x128xbf16>
      %cst_11 = arith.constant dense<0.000000e+00> : vector<16x128xf32>
      %29 = tpu.matmul %26, %28, %cst_11 {dimension_numbers = #tpu.dot_dimension_numbers<[1], [0], [0], [1], [0, 0, 1, 1], [], []>} : vector<16x128xbf16>, vector<128x128xbf16>, vector<16x128xf32> -> vector<16x128xf32>
      %30 = arith.addf %27, %29 : vector<16x128xf32>
      %c0_12 = arith.constant 0 : index
      %c0_13 = arith.constant 0 : index
      %31 = vector.load %arg12[%c0_12, %c0_13] : memref<16x128xf32, #tpu.memory_space<vmem>>, vector<16x128xf32>
      tpu.vector_store %arg12[%c0_12, %c0_13], %30 {strides = array<i32>} : memref<16x128xf32, #tpu.memory_space<vmem>>, vector<16x128xf32>,
    } else {
    }
    %c0_i32_3 = arith.constant 0 : i32
    %17 = arith.cmpi eq, %arg1, %c0_i32_3 : i32
    %18 = arith.extui %17 : i1 to i32
    %c0_i32_4 = arith.constant 0 : i32
    %19 = arith.cmpi ne, %18, %c0_i32_4 : i32
    scf.if %19 {
      %c0 = arith.constant 0 : index
      %c0_5 = arith.constant 0 : index
      %20 = vector.load %arg11[%c0, %c0_5] : memref<16x128xf32, #tpu.memory_space<vmem>>, vector<16x128xf32>
      %21 = arith.truncf %20 : vector<16x128xf32> to vector<16x128xbf16>
      %c0_6 = arith.constant 0 : index
      %c0_7 = arith.constant 0 : index
      %22 = vector.load %arg8[%c0_6, %c0_7] : memref<128x128xbf16, #tpu.memory_space<vmem>>, vector<128x128xbf16>
      %cst = arith.constant dense<0.000000e+00> : vector<16x128xf32>
      %23 = tpu.matmul %21, %22, %cst {dimension_numbers = #tpu.dot_dimension_numbers<[1], [0], [0], [1], [0, 0, 1, 1], [], []>} : vector<16x128xbf16>, vector<128x128xbf16>, vector<16x128xf32> -> vector<16x128xf32>
      %c0_8 = arith.constant 0 : index
      %c0_9 = arith.constant 0 : index
      %24 = vector.load %arg12[%c0_8, %c0_9] : memref<16x128xf32, #tpu.memory_space<vmem>>, vector<16x128xf32>
      %25 = arith.truncf %24 : vector<16x128xf32> to vector<16x128xbf16>
      %c0_10 = arith.constant 0 : index
      %c0_11 = arith.constant 0 : index
      %26 = vector.load %arg9[%c0_10, %c0_11] : memref<128x128xbf16, #tpu.memory_space<vmem>>, vector<128x128xbf16>
      %cst_12 = arith.constant dense<0.000000e+00> : vector<16x128xf32>
      %27 = tpu.matmul %25, %26, %cst_12 {dimension_numbers = #tpu.dot_dimension_numbers<[1], [0], [0], [1], [0, 0, 1, 1], [], []>} : vector<16x128xbf16>, vector<128x128xbf16>, vector<16x128xf32> -> vector<16x128xf32>
      %28 = arith.addf %23, %27 : vector<16x128xf32>
      %c0_13 = arith.constant 0 : index
      %c0_14 = arith.constant 0 : index
      %29 = vector.load %arg7[%c0_13, %c0_14] : memref<16x128xf32, #tpu.memory_space<vmem>>, vector<16x128xf32>
      %30 = arith.addf %28, %29 : vector<16x128xf32>
      %31 = math.tanh %30 : vector<16x128xf32>
      %c0_15 = arith.constant 0 : index
      %c0_16 = arith.constant 0 : index
      %32 = vector.load %arg10[%c0_15, %c0_16] : memref<16x128xf32, #tpu.memory_space<vmem>>, vector<16x128xf32>
      tpu.vector_store %arg10[%c0_15, %c0_16], %31 {strides = array<i32>} : memref<16x128xf32, #tpu.memory_space<vmem>>, vector<16x128xf32>,
    } else {
    }
    return
  }
  func.func @transform_0(%arg0: i32, %arg1: i32, %arg2: memref<1x4xi32, #tpu.memory_space<smem>>) -> (i32, i32) {
    %0 = arith.index_cast %arg0 : i32 to index
    %c0 = arith.constant 0 : index
    %1 = memref.load %arg2[%0, %c0] : memref<1x4xi32, #tpu.memory_space<smem>>
    %2 = arith.index_cast %arg0 : i32 to index
    %c1 = arith.constant 1 : index
    %3 = memref.load %arg2[%2, %c1] : memref<1x4xi32, #tpu.memory_space<smem>>
    %c1_i32 = arith.constant 1 : i32
    %4 = arith.subi %3, %c1_i32 : i32
    %c0_i32 = arith.constant 0 : i32
    %5 = arith.maxsi %4, %c0_i32 : i32
    %6 = arith.minsi %arg1, %5 : i32
    %7 = arith.addi %1, %6 : i32
    %c0_i32_0 = arith.constant 0 : i32
    %8 = arith.minsi %7, %c0_i32_0 : i32
    %c0_i32_1 = arith.constant 0 : i32
    %c0_i32_2 = arith.constant 0 : i32
    return %8, %c0_i32_1 : i32, i32
  }
  func.func @transform_1(%arg0: i32, %arg1: i32, %arg2: memref<1x4xi32, #tpu.memory_space<smem>>) -> (i32, i32) {
    %0 = arith.index_cast %arg0 : i32 to index
    %c0 = arith.constant 0 : index
    %1 = memref.load %arg2[%0, %c0] : memref<1x4xi32, #tpu.memory_space<smem>>
    %2 = arith.index_cast %arg0 : i32 to index
    %c1 = arith.constant 1 : index
    %3 = memref.load %arg2[%2, %c1] : memref<1x4xi32, #tpu.memory_space<smem>>
    %c1_i32 = arith.constant 1 : i32
    %4 = arith.subi %3, %c1_i32 : i32
    %c0_i32 = arith.constant 0 : i32
    %5 = arith.maxsi %4, %c0_i32 : i32
    %6 = arith.minsi %arg1, %5 : i32
    %7 = arith.addi %1, %6 : i32
    %c0_i32_0 = arith.constant 0 : i32
    %8 = arith.minsi %7, %c0_i32_0 : i32
    %c0_i32_1 = arith.constant 0 : i32
    %c0_i32_2 = arith.constant 0 : i32
    return %c0_i32_1, %8 : i32, i32
  }
  func.func @transform_2(%arg0: i32, %arg1: i32, %arg2: memref<1x4xi32, #tpu.memory_space<smem>>) -> (i32, i32) {
    %0 = arith.index_cast %arg0 : i32 to index
    %c2 = arith.constant 2 : index
    %1 = memref.load %arg2[%0, %c2] : memref<1x4xi32, #tpu.memory_space<smem>>
    %2 = arith.index_cast %arg0 : i32 to index
    %c3 = arith.constant 3 : index
    %3 = memref.load %arg2[%2, %c3] : memref<1x4xi32, #tpu.memory_space<smem>>
    %c1_i32 = arith.constant 1 : i32
    %4 = arith.subi %3, %c1_i32 : i32
    %c0_i32 = arith.constant 0 : i32
    %5 = arith.maxsi %4, %c0_i32 : i32
    %6 = arith.minsi %arg1, %5 : i32
    %7 = arith.addi %1, %6 : i32
    %c0_i32_0 = arith.constant 0 : i32
    %8 = arith.minsi %7, %c0_i32_0 : i32
    %c0_i32_1 = arith.constant 0 : i32
    %c0_i32_2 = arith.constant 0 : i32
    return %8, %c0_i32_1 : i32, i32
  }
  func.func @transform_3(%arg0: i32, %arg1: i32, %arg2: memref<1x4xi32, #tpu.memory_space<smem>>) -> (i32, i32) {
    %0 = arith.index_cast %arg0 : i32 to index
    %c2 = arith.constant 2 : index
    %1 = memref.load %arg2[%0, %c2] : memref<1x4xi32, #tpu.memory_space<smem>>
    %2 = arith.index_cast %arg0 : i32 to index
    %c3 = arith.constant 3 : index
    %3 = memref.load %arg2[%2, %c3] : memref<1x4xi32, #tpu.memory_space<smem>>
    %c1_i32 = arith.constant 1 : i32
    %4 = arith.subi %3, %c1_i32 : i32
    %c0_i32 = arith.constant 0 : i32
    %5 = arith.maxsi %4, %c0_i32 : i32
    %6 = arith.minsi %arg1, %5 : i32
    %7 = arith.addi %1, %6 : i32
    %c0_i32_0 = arith.constant 0 : i32
    %8 = arith.minsi %7, %c0_i32_0 : i32
    %c0_i32_1 = arith.constant 0 : i32
    %c0_i32_2 = arith.constant 0 : i32
    return %c0_i32_1, %8 : i32, i32
  }
  func.func @transform_4(%arg0: i32, %arg1: i32, %arg2: memref<1x4xi32, #tpu.memory_space<smem>>) -> (i32, i32) {
    %c0_i32 = arith.constant 0 : i32
    %c0_i32_0 = arith.constant 0 : i32
    return %arg0, %c0_i32 : i32, i32
  }
  func.func @transform_5(%arg0: i32, %arg1: i32, %arg2: memref<1x4xi32, #tpu.memory_space<smem>>) -> (i32, i32) {
    %c0_i32 = arith.constant 0 : i32
    %c0_i32_0 = arith.constant 0 : i32
    %c0_i32_1 = arith.constant 0 : i32
    return %c0_i32, %c0_i32_0 : i32, i32
  }
  func.func @transform_6(%arg0: i32, %arg1: i32, %arg2: memref<1x4xi32, #tpu.memory_space<smem>>) -> (i32, i32) {
    %c0_i32 = arith.constant 0 : i32
    %c0_i32_0 = arith.constant 0 : i32
    %c0_i32_1 = arith.constant 0 : i32
    return %c0_i32, %c0_i32_0 : i32, i32
  }
  func.func @transform_7(%arg0: i32, %arg1: i32, %arg2: memref<1x4xi32, #tpu.memory_space<smem>>) -> (i32, i32) {
    %c0_i32 = arith.constant 0 : i32
    %c0_i32_0 = arith.constant 0 : i32
    return %arg0, %c0_i32 : i32, i32
  }
}

</mosaic_0001>

<bundles_post_ra>
// kernel: tpu_custom_call.1
= control target key start
LH: loop header
LB: loop body
LE: loop exit
PB: predicated region body
PF: predicated region fallthrough
CT: control target
= control target key end

     0   :  { %s1437_s0 = inlined_call_operand.hbm [shape: s32[1,4], index: 0, kind: input, shape index: {}]   ;;  %s1438_s1 = inlined_call_operand.hbm [shape: bf16[128,128], index: 1, kind: input, shape index: {}]   ;;  %s1439_s2 = inlined_call_operand.vmem [shape: s32[1,128], index: 2, kind: input, shape index: {}]   ;;  %s1440_s3 = inlined_call_operand.hbm [shape: bf16[128,128], index: 3, kind: input, shape index: {}]   ;;  %s1441_s4 = inlined_call_operand.vmem [shape: s32[1,128], index: 4, kind: input, shape index: {}]   ;;  %s1442_s5 = inlined_call_operand.vmem [shape: f32[16,128], index: 5, kind: input, shape index: {}]   ;;  %s1443_s6 = inlined_call_operand.hbm [shape: bf16[128,128], index: 6, kind: input, shape index: {}]   ;;  %s1444_s7 = inlined_call_operand.hbm [shape: bf16[128,128], index: 7, kind: input, shape index: {}]   ;;  %s1445_s8 = inlined_call_operand.hbm [shape: f32[16,128], index: 8, kind: output, shape index: {}]  }
   0x1   :  { %s1067_s29 = scalar_lea.hbm %s1437_s0, 16 }
   0x2   :  { %p1068_p0 = scmp.ne.s32.totalorder %s1437_s0, %s1067_s29  ;;  %p1071_p1 = scmp.lt.u32.totalorder %s1067_s29, %s1437_s0 }
   0x4   :  { %p1073_p2 = pnand %p1071_p1, %p1068_p0 }
   0x6   :  { %1076 = shalt.err (!%p1073_p2)  }
   0x7   :  { %s1201_s12 = smov [#allocation5]  }
   0x8   :  { %14 = dma.hbm_to_smem %s1437_s0, 16, %s1201_s12, [#allocation4] }
   0x9   :  { %1191 = dma.done.wait [#allocation4], 16 }
   0xa   :  { %1192 = vsyncadd [#allocation4], 4294967280 }
   0xb   :  { %16 = sfence }
   0xc   :  { %17 = vsyncpa [#allocation7], 0 }
   0xd   :  { %18 = vsyncpa [#allocation10], 0 }
   0xe   :  { %19 = vsyncpa [#allocation13], 0 }
   0xf   :  { %20 = vsyncpa [#allocation8], 0  ;;  %s821_s15 = sld [smem:[#allocation5 + $0x3]]  ;;  %s815_s16 = sld [smem:[#allocation5 + $0x1]] }
  0x10   :  { %s1202_s17 = smov [#allocation9]   ;;  %s820_s19 = sld [smem:[#allocation5 + $0x2]] }
  0x11   :  { %s98_s18 = sshll.u32 %s1202_s17, 4  ;;  %s24_s20 = sld [smem:[#allocation5]]  ;;  %s1276_s18 = int_to_ptr.vmem [resolvable:$true] %s98_s18 }
  0x12   :  { %s1203_s22 = smov [#allocation6]   ;;  %s1204_s25 = smov [#allocation11]  }
  0x13   :  { %s41_s23 = sshll.u32 %s1203_s22, 4  ;;  %s143_s26 = sshll.u32 %s1204_s25, 4  ;;  %s1278_s23 = int_to_ptr.vmem [resolvable:$true] %s41_s23  ;;  %s1282_s26 = int_to_ptr.vmem [resolvable:$true] %s143_s26 }
  0x14   :  { %s1205_s10 = smov [#allocation12]  }
  0x15   :  { %s822_s21 = sadd.s32 4294967295, %s821_s15  ;;  %s816_s0 = sadd.s32 4294967295, %s815_s16 }
  0x16   :  { %p85_p3 = scmp.gt.s32.totalorder %s822_s21, 0  ;;  %p28_p4 = scmp.gt.s32.totalorder %s816_s0, 0 }
  0x17   :  { %s1288_s11 = sshll.u32 %s1205_s10, 4  ;;  %s1079_s15 = scalar_lea.hbm %s1440_s3, 1024  ;;  %s1328_s11 = int_to_ptr.vmem [resolvable:$true] %s1288_s11 }
  0x18   :  { %s1447_s21 = smov (!%p85_p3, %s822_s21), 0  ;;  %s1451_s0 = smov (!%p28_p4, %s816_s0), 0 }
  0x19   :  { %s1449_s21 = smov (%p85_p3, %s1447_s21), 0  ;;  %s1453_s0 = smov (%p28_p4, %s1451_s0), 0 }
  0x1a   :  { %s89_s24 = sadd.s32 %s820_s19, %s1449_s21  ;;  %s1280_s27 = sadd.s32 %s1453_s0, %s24_s20 }
  0x1b   :  { %p90_p5 = scmp.lt.s32.totalorder %s89_s24, 0  ;;  %p33_p6 = scmp.lt.s32.totalorder %s1280_s27, 0 }
  0x1d   :  { %s1455_s24 = smov (!%p90_p5, %s89_s24), 0 }
  0x1e   :  { %s890_s28 = sshll.u32 %s1455_s24, 10 }
  0x1f   :  { %s97_s9 = scalar_lea.hbm %s1440_s3, %s890_s28 }
  0x20   :  { %s1077_s12 = scalar_lea.hbm %s97_s9, 1024  ;;  %p1080_p8 = scmp.lt.u32.totalorder %s97_s9, %s1440_s3 }
  0x21   :  { %p1078_p7 = scmp.ne.s32.totalorder %s97_s9, %s1077_s12  ;;  %p1081_p9 = scmp.lt.u32.totalorder %s1079_s15, %s1077_s12 }
  0x22   :  { %p1083_p11 = scmp.lt.u32.totalorder %s1077_s12, %s97_s9 }
  0x23   :  { %p1082_p10 = por %p1081_p9, %p1080_p8 }
  0x25   :  { %p1084_p12 = por %p1083_p11, %p1082_p10 }
  0x27   :  { %p1085_p13 = pnand %p1084_p12, %p1078_p7 }
  0x29   :  { %1088 = shalt.err (!%p1085_p13)
}
  0x2a   :  { %s1089_s19 = scalar_lea.vmem %s1276_s18, 1024  ;;  %p1094_p1 = scmp.lt.s32.totalorder %s1276_s18, %s1276_s18 }
  0x2b   :  { %p1090_p0 = scmp.ne.s32.totalorder %s1276_s18, %s1089_s19  ;;  %p1095_p2 = scmp.lt.s32.totalorder %s1089_s19, %s1089_s19 }
  0x2d   :  { %p1096_p3 = por %p1095_p2, %p1094_p1 }
  0x2f   :  { %p1097_p4 = pnand %p1096_p3, %p1090_p0 }
  0x31   :  { %1100 = shalt.err (!%p1097_p4)
}
  0x32   :  { %s1206_s20 = smov 64   ;;  %s1207_s3 = smov 4  }
  0x33   :  { %104 = dma.hbm_to_vmem [thread:$0]  %s97_s9, 1024, %s1276_s18, [#allocation10], %s1206_s20, %s1206_s20, %s1207_s3  }
  0x34   :  { %s1457_s27 = smov (!%p33_p6, %s1280_s27), 0  ;;  %s1101_s0 = scalar_lea.hbm %s1443_s6, 1024 }
  0x35   :  { %p1102_p5 = scmp.ne.s32.totalorder %s1443_s6, %s1101_s0  ;;  %p1105_p7 = scmp.lt.u32.totalorder %s1101_s0, %s1443_s6 }
  0x37   :  { %p1107_p8 = pnand %p1105_p7, %p1102_p5 }
  0x39   :  { %1110 = shalt.err (!%p1107_p8)
}
  0x3a   :  { %s1111_s18 = scalar_lea.vmem %s1282_s26, 1024  ;;  %p1116_p6 = scmp.lt.s32.totalorder %s1282_s26, %s1282_s26 }
  0x3b   :  { %p1112_p9 = scmp.ne.s32.totalorder %s1282_s26, %s1111_s18  ;;  %p1117_p10 = scmp.lt.s32.totalorder %s1111_s18, %s1111_s18 }
  0x3d   :  { %p1118_p11 = por %p1117_p10, %p1116_p6 }
  0x3f   :  { %p1119_p12 = pnand %p1118_p11, %p1112_p9 }
  0x41   :  { %1122 = shalt.err (!%p1119_p12)
}
  0x42   :  { %149 = dma.hbm_to_vmem [thread:$0]  %s1443_s6, 1024, %s1282_s26, [#allocation10], %s1206_s20, %s1206_s20, %s1207_s3  }
  0x43   :  { %s886_s10 = sshll.u32 %s1457_s27, 10  ;;  %s1125_s19 = scalar_lea.hbm %s1438_s1, 1024 }
  0x44   :  { %s40_s14 = scalar_lea.hbm %s1438_s1, %s886_s10 }
  0x45   :  { %s1123_s15 = scalar_lea.hbm %s40_s14, 1024  ;;  %p1126_p0 = scmp.lt.u32.totalorder %s40_s14, %s1438_s1 }
  0x46   :  { %p1124_p13 = scmp.ne.s32.totalorder %s40_s14, %s1123_s15  ;;  %p1127_p1 = scmp.lt.u32.totalorder %s1125_s19, %s1123_s15 }
  0x47   :  { %p1129_p3 = scmp.lt.u32.totalorder %s1123_s15, %s40_s14 }
  0x48   :  { %p1128_p2 = por %p1127_p1, %p1126_p0 }
  0x4a   :  { %p1130_p4 = por %p1129_p3, %p1128_p2 }
  0x4c   :  { %p1131_p5 = pnand %p1130_p4, %p1124_p13 }
  0x4e   :  { %1134 = shalt.err (!%p1131_p5)
}
  0x4f   :  { %s1135_s6 = scalar_lea.vmem %s1278_s23, 1024  ;;  %p1140_p8 = scmp.lt.s32.totalorder %s1278_s23, %s1278_s23 }
  0x50   :  { %p1136_p7 = scmp.ne.s32.totalorder %s1278_s23, %s1135_s6  ;;  %p1141_p9 = scmp.lt.s32.totalorder %s1135_s6, %s1135_s6 }
  0x52   :  { %p1142_p6 = por %p1141_p9, %p1140_p8 }
  0x54   :  { %p1143_p10 = pnand %p1142_p6, %p1136_p7 }
  0x56   :  { %1146 = shalt.err (!%p1143_p10)
}
  0x57   :  { %47 = dma.hbm_to_vmem [thread:$0]  %s40_s14, 1024, %s1278_s23, [#allocation7], %s1206_s20, %s1206_s20, %s1207_s3  }
  0x58   :  { %s1147_s27 = scalar_lea.hbm %s1444_s7, 1024 }
  0x59   :  { %p1148_p11 = scmp.ne.s32.totalorder %s1444_s7, %s1147_s27  ;;  %p1151_p12 = scmp.lt.u32.totalorder %s1147_s27, %s1444_s7 }
  0x5b   :  { %p1153_p13 = pnand %p1151_p12, %p1148_p11 }
  0x5d   :  { %1156 = shalt.err (!%p1153_p13)
}
  0x5e   :  { %s1157_s29 = scalar_lea.vmem %s1328_s11, 1024  ;;  %p1162_p1 = scmp.lt.s32.totalorder %s1328_s11, %s1328_s11 }
  0x5f   :  { %p1158_p0 = scmp.ne.s32.totalorder %s1328_s11, %s1157_s29  ;;  %p1163_p2 = scmp.lt.s32.totalorder %s1157_s29, %s1157_s29 }
  0x61   :  { %p1164_p3 = por %p1163_p2, %p1162_p1 }
  0x63   :  { %p1165_p4 = pnand %p1164_p3, %p1158_p0 }
  0x65   :  { %1168 = shalt.err (!%p1165_p4)
}
  0x66   :  { %161 = dma.hbm_to_vmem [thread:$0]  %s1444_s7, 1024, %s1328_s11, [#allocation13], %s1206_s20, %s1206_s20, %s1207_s3  }
  0x67   :  { %1193 = dma.done.wait [#allocation7], 1024  }
  0x68   :  { %1194 = vsyncadd [#allocation7], 4294966272 }
  0x69   :  { %1195 = dma.done.wait [#allocation10], 2048  }
  0x6a   :  { %1196 = vsyncadd [#allocation10], 4294965248 }
  0x6b   :  { %1197 = dma.done.wait [#allocation13], 1024  }
  0x6c   :  { %1198 = vsyncadd [#allocation13], 4294966272  ;;  %v298_v0 = vlaneseq  ;;  %s1367_s30 = sld [smem:[#allocation5 + $0x1]]  ;;  %v1208_v1 = vmov 0.0   ;;  %s833_s7 = sld [smem:[#allocation5 + $0x3]] }
  0x6d   :  { %293 = vst [vmem:[#allocation2] sm:$0xff] %v1208_v1  ;;  %294 = vst [vmem:[#allocation2 + $0x8] sm:$0xff] %v1208_v1  ;;  %s219_s11 = sld [smem:[#allocation5]]  ;;  %s832_s3 = sld [smem:[#allocation5 + $0x2]] }
  0x6e   :  { %295 = vst [vmem:[#allocation3] sm:$0xff] %v1208_v1  ;;  %296 = vst [vmem:[#allocation3 + $0x8] sm:$0xff] %v1208_v1  ;;  %v1373_v2 = vshrl.u32 %v298_v0, 7 }
  0x70   :  { %v1376_v3 = vadd.s32 8, %v1373_v2 }
  0x72   :  { %s827_s20 = sadd.s32 4294967295, %s1367_s30  ;;  %s834_s9 = sadd.s32 4294967295, %s833_s7 }
  0x73   :  { %p223_p5 = scmp.gt.s32.totalorder %s827_s20, 0  ;;  %p265_p7 = scmp.gt.s32.totalorder %s834_s9, 0 }
  0x74   :  { %p841_p6 = scmp.le.s32.totalorder %s1367_s30, 0 }
  0x75   :  { %s1459_s20 = smov (!%p223_p5, %s827_s20), 0  ;;  %s1461_s9 = smov (!%p265_p7, %s834_s9), 0 }
  0x76   :  { %s1463_s20 = smov (%p223_p5, %s1459_s20), 0  ;;  %s1465_s9 = smov (%p265_p7, %s1461_s9), 0 }
  0x77   :  { %s227_s10 = sadd.s32 %s1463_s20, %s219_s11  ;;  %s269_s12 = sadd.s32 %s832_s3, %s1465_s9  ;;  %v1031_v4 = vld [vmem:[#allocation6] sm:$0xff] (!%p841_p6)   ;;  %v1209_v5 = vmov (!%p841_p6), 0.0   ;;  %v1032_v6 = vld [vmem:[#allocation6 + $0x8] sm:$0xff] (!%p841_p6)   ;;  %vm1210_vm0 = vmmov (!%p841_p6), 0   ;;  %v1033_v7 = vld [vmem:[#allocation6 + $0x10] sm:$0xff] (!%p841_p6)  }
  0x78   :  { %p228_p8 = scmp.lt.s32.totalorder %s227_s10, 0  ;;  %p270_p9 = scmp.lt.s32.totalorder %s269_s12, 0  ;;  %933 = vmatprep.subr.bf16.mxu0 (!%p841_p6), %v1209_v5  ;;  %949 = vmatprep.mubr.msk.bf16.mxu0 (!%p841_p6), %vm1210_vm0, %v1209_v5  ;;  %v1034_v8 = vld [vmem:[#allocation6 + $0x18] sm:$0xff] (!%p841_p6)   ;;  %v1035_v9 = vld [vmem:[#allocation6 + $0x20] sm:$0xff] (!%p841_p6)   ;;  %v1036_v10 = vld [vmem:[#allocation6 + $0x28] sm:$0xff] (!%p841_p6)  }
  0x79   :  { %310 = sbr.rel (%p841_p6) target bundleno = 369 (0x171), region = 53  ;;  %934 = vmatpush3.bf16.msra.mxu0 (!%p841_p6), %v1031_v4  ;;  %v1037_v11 = vld [vmem:[#allocation6 + $0x30] sm:$0xff] (!%p841_p6)   ;;  %v1038_v13 = vld [vmem:[#allocation6 + $0x38] sm:$0xff] (!%p841_p6)   ;;  %v1211_v14 = vmov (!%p841_p6), 1.0|1.0   ;;  %v321_v15 = vld [vmem:[#allocation2] sm:$0xff] (!%p841_p6) }
  0x7a   :  { %s1467_s10 = smov (!%p228_p8, %s227_s10), 0  ;;  %s1469_s12 = smov (!%p270_p9, %s269_s12), 0 }
  0x7b   :  { %s1471_s10 = smov (!%p228_p8, %s1467_s10), 0  ;;  %s1473_s12 = smov (!%p270_p9, %s1469_s12), 0 }
  0x7c   :  { %s232_s15 = scalar_lea.vmem %s1439_s2, %s1471_s10  ;;  %s274_s19 = scalar_lea.vmem %s1441_s4, %s1473_s12  ;;  %935 = vmatprep.subr.bf16.mxu0 (!%p841_p6), %v1209_v5  ;;  %v322_v17 = vld [vmem:[#allocation2 + $0x8] sm:$0xff] (!%p841_p6) }
  0x7d   :  { %936 = vmatpush3.bf16.msra.mxu0 (!%p841_p6), %v1032_v6  ;;  %v842_v12 = vld [vmem:[%s232_s15] ss:$0 sm:$0xff] (!%p841_p6) }
  0x7e   :  { %937 = vmatprep.subr.bf16.mxu0 (!%p841_p6), %v1209_v5  ;;  %vm316_vm1 = vcmp.eq.s32.totalorder (!%p841_p6), %v1373_v2, %v842_v12  ;;  %vm317_vm2 = vcmp.eq.s32.totalorder (!%p841_p6), %v1376_v3, %v842_v12 }
  0x7f   :  { %vm851_vm3 = vmpackc.low (!%p841_p6), %vm317_vm2, %vm316_vm1 }
  0x81   :  { %938 = vmatpush3.bf16.msra.mxu0 %v1033_v7 }
  0x82   :  { %939 = vmatprep.subr.bf16.mxu0 %v1209_v5 }
  0x85   :  { %940 = vmatpush3.bf16.msra.mxu0 %v1034_v8 }
  0x86   :  { %941 = vmatprep.subr.bf16.mxu0 %v1209_v5 }
  0x89   :  { %942 = vmatpush3.bf16.msra.mxu0 %v1035_v9 }
  0x8a   :  { %943 = vmatprep.subr.bf16.mxu0 %v1209_v5 }
  0x8d   :  { %944 = vmatpush3.bf16.msra.mxu0 %v1036_v10 }
  0x8e   :  { %945 = vmatprep.subr.bf16.mxu0 %v1209_v5 }
  0x91   :  { %946 = vmatpush3.bf16.msra.mxu0 %v1037_v11 }
  0x92   :  { %947 = vmatprep.subr.bf16.mxu0 %v1209_v5 }
  0x95   :  { %948 = vmatpush3.bf16.msra.mxu0 %v1038_v13 }
  0x98   :  { %950 = vmatmul.mubr.msk.bf16.vlgmr.msra.gmra.mrb[0].mxu0 %vm851_vm3, %v1211_v14 }
 0x16b   :  { %v421_v16 = vpop.f32.mrb[0].mxu0 }
 0x16c   :  { %v428_v18 = vadd.f32 %v421_v16, %v321_v15  ;;  %v951_v19 = vpop.f32.mrb[1].mxu0 }
 0x16d   :  { %v424_v20 = vpop.f32.mrb[2].mxu0 }
 0x16e   :  { %430 = vst [vmem:[#allocation2] sm:$0xff] %v428_v18  ;;  %v429_v21 = vadd.f32 %v424_v20, %v322_v17  ;;  %v952_v22 = vpop.f32.mrb[3].mxu0 }
 0x170   :  { %431 = vst [vmem:[#allocation2 + $0x8] sm:$0xff] %v429_v21 }
 0x171 PF:  { %s853_s2 = sld [smem:[#allocation5 + $0x3]] }
 0x177   :  { %p855_p10 = scmp.le.s32.totalorder %s853_s2, 0 }
 0x178   :  { %v1039_v23 = vld [vmem:[#allocation9] sm:$0xff] (!%p855_p10)   ;;  %v1212_v24 = vmov (!%p855_p10), 0.0   ;;  %v1040_v25 = vld [vmem:[#allocation9 + $0x8] sm:$0xff] (!%p855_p10)   ;;  %vm1213_vm4 = vmmov (!%p855_p10), 0   ;;  %v1041_v26 = vld [vmem:[#allocation9 + $0x10] sm:$0xff] (!%p855_p10)  }
 0x179   :  { %437 = sbr.rel (%p855_p10) target bundleno = 626 (0x272), region = 57  ;;  %953 = vmatprep.subr.bf16.mxu0 (!%p855_p10), %v1212_v24  ;;  %969 = vmatprep.mubr.msk.bf16.mxu0 (!%p855_p10), %vm1213_vm4, %v1212_v24  ;;  %v1042_v27 = vld [vmem:[#allocation9 + $0x18] sm:$0xff] (!%p855_p10)   ;;  %v1043_v28 = vld [vmem:[#allocation9 + $0x20] sm:$0xff] (!%p855_p10)   ;;  %v1044_v29 = vld [vmem:[#allocation9 + $0x28] sm:$0xff] (!%p855_p10)   ;;  %v1214_v33 = vmov (!%p855_p10), 1.0|1.0  }
 0x17a   :  { %954 = vmatpush3.bf16.msra.mxu0 (!%p855_p10), %v1039_v23  ;;  %v1045_v30 = vld [vmem:[#allocation9 + $0x30] sm:$0xff] (!%p855_p10)   ;;  %v1046_v32 = vld [vmem:[#allocation9 + $0x38] sm:$0xff] (!%p855_p10)  }
 0x17b   :  { %955 = vmatprep.subr.bf16.mxu0 (!%p855_p10), %v1212_v24  ;;  %v856_v31 = vld [vmem:[%s274_s19] ss:$0 sm:$0xff] (!%p855_p10)  ;;  %v449_v36 = vld [vmem:[#allocation3 + $0x8] sm:$0xff] (!%p855_p10) }
 0x17c   :  { %vm443_vm5 = vcmp.eq.s32.totalorder (!%p855_p10), %v1373_v2, %v856_v31  ;;  %vm444_vm6 = vcmp.eq.s32.totalorder (!%p855_p10), %v1376_v3, %v856_v31  ;;  %v448_v34 = vld [vmem:[#allocation3] sm:$0xff] (!%p855_p10) }
 0x17d   :  { %vm865_vm7 = vmpackc.low (!%p855_p10), %vm444_vm6, %vm443_vm5 }
 0x17e   :  { %956 = vmatpush3.bf16.msra.mxu0 (!%p855_p10), %v1040_v25 }
 0x17f   :  { %957 = vmatprep.subr.bf16.mxu0 (!%p855_p10), %v1212_v24 }
 0x182   :  { %958 = vmatpush3.bf16.msra.mxu0 %v1041_v26 }
 0x183   :  { %959 = vmatprep.subr.bf16.mxu0 %v1212_v24 }
 0x186   :  { %960 = vmatpush3.bf16.msra.mxu0 %v1042_v27 }
 0x187   :  { %961 = vmatprep.subr.bf16.mxu0 %v1212_v24 }
 0x18a   :  { %962 = vmatpush3.bf16.msra.mxu0 %v1043_v28 }
 0x18b   :  { %963 = vmatprep.subr.bf16.mxu0 %v1212_v24 }
 0x18e   :  { %964 = vmatpush3.bf16.msra.mxu0 %v1044_v29 }
 0x18f   :  { %965 = vmatprep.subr.bf16.mxu0 %v1212_v24 }
 0x192   :  { %966 = vmatpush3.bf16.msra.mxu0 %v1045_v30 }
 0x193   :  { %967 = vmatprep.subr.bf16.mxu0 %v1212_v24 }
 0x196   :  { %968 = vmatpush3.bf16.msra.mxu0 %v1046_v32 }
 0x199   :  { %970 = vmatmul.mubr.msk.bf16.vlgmr.msra.gmra.mrb[0].mxu0 %vm865_vm7, %v1214_v33 }
 0x26c   :  { %v548_v35 = vpop.f32.mrb[0].mxu0 }
 0x26d   :  { %v555_v37 = vadd.f32 %v548_v35, %v448_v34  ;;  %v971_v38 = vpop.f32.mrb[1].mxu0 }
 0x26e   :  { %v551_v39 = vpop.f32.mrb[2].mxu0 }
 0x26f   :  { %557 = vst [vmem:[#allocation3] sm:$0xff] %v555_v37  ;;  %v556_v40 = vadd.f32 %v551_v39, %v449_v36  ;;  %v972_v41 = vpop.f32.mrb[3].mxu0 }
 0x271   :  { %558 = vst [vmem:[#allocation3 + $0x8] sm:$0xff] %v556_v40 }
 0x272 PF:  { %973 = vmatprep.subr.bf16.mxu0 %v1208_v1  ;;  %993 = vmatprep.subr.bf16.mxu1 %v1208_v1  ;;  %v1047_v42 = vld [vmem:[#allocation12] sm:$0xff]   ;;  %vm1215_vm8 = vmmov 0   ;;  %v1049_v44 = vld [vmem:[#allocation12 + $0x8] sm:$0xff]   ;;  %v1051_v46 = vld [vmem:[#allocation12 + $0x10] sm:$0xff]   ;;  %s1216_s27 = smov [#allocation14]  }
 0x273   :  { %v1048_v43 = vld [vmem:[#allocation11] sm:$0xff]   ;;  %989 = vmatprep.mubr.msk.bf16.mxu0 %vm1215_vm8, %v1208_v1  ;;  %1009 = vmatprep.mubr.msk.bf16.mxu1 %vm1215_vm8, %v1208_v1  ;;  %v1050_v45 = vld [vmem:[#allocation11 + $0x8] sm:$0xff]   ;;  %v1052_v47 = vld [vmem:[#allocation11 + $0x10] sm:$0xff]   ;;  %s791_s0 = sshll.u32 %s1216_s27, 4  ;;  %s792_s0 = int_to_ptr.vmem [resolvable:$true] %s791_s0 }
 0x274   :  { %974 = vmatpush3.bf16.msra.mxu0 %v1047_v42  ;;  %994 = vmatpush3.bf16.msra.mxu1 %v1048_v43  ;;  %v1053_v48 = vld [vmem:[#allocation12 + $0x18] sm:$0xff]   ;;  %v1055_v50 = vld [vmem:[#allocation12 + $0x20] sm:$0xff]   ;;  %v1057_v52 = vld [vmem:[#allocation12 + $0x28] sm:$0xff]   ;;  %s1169_s24 = scalar_lea.vmem %s792_s0, 256  ;;  %p1174_p12 = scmp.lt.s32.totalorder %s792_s0, %s792_s0 }
 0x275   :  { %975 = vmatprep.subr.bf16.mxu0 %v1208_v1  ;;  %995 = vmatprep.subr.bf16.mxu1 %v1208_v1  ;;  %v1054_v49 = vld [vmem:[#allocation11 + $0x18] sm:$0xff]   ;;  %v1056_v51 = vld [vmem:[#allocation11 + $0x20] sm:$0xff]   ;;  %v1058_v53 = vld [vmem:[#allocation11 + $0x28] sm:$0xff]   ;;  %p1170_p11 = scmp.ne.s32.totalorder %s792_s0, %s1169_s24  ;;  %p1175_p13 = scmp.lt.s32.totalorder %s1169_s24, %s1169_s24 }
 0x276   :  { %v1059_v54 = vld [vmem:[#allocation12 + $0x30] sm:$0xff]   ;;  %v1061_v56 = vld [vmem:[#allocation12 + $0x38] sm:$0xff]   ;;  %v562_v60 = vld [vmem:[#allocation2] sm:$0xff] }
 0x277   :  { %v1060_v55 = vld [vmem:[#allocation11 + $0x30] sm:$0xff]   ;;  %v1062_v59 = vld [vmem:[#allocation11 + $0x38] sm:$0xff]   ;;  %v563_v61 = vld [vmem:[#allocation2 + $0x8] sm:$0xff]  ;;  %p1176_p0 = por %p1175_p13, %p1174_p12 }
 0x278   :  { %976 = vmatpush3.bf16.msra.mxu0 %v1049_v44  ;;  %996 = vmatpush3.bf16.msra.mxu1 %v1050_v45  ;;  %v581_v57 = vld [vmem:[#allocation3] sm:$0xff]  ;;  %v582_v58 = vld [vmem:[#allocation3 + $0x8] sm:$0xff]  ;;  %v564_v63 = vpack.c.bf16 %v563_v61, %v562_v60 }
 0x279   :  { %977 = vmatprep.subr.bf16.mxu0 %v1208_v1  ;;  %997 = vmatprep.subr.bf16.mxu1 %v1208_v1  ;;  %v583_v62 = vpack.c.bf16 %v582_v58, %v581_v57  ;;  %v778_v3 = vld [vmem:[%s1442_s5] sm:$0xff]  ;;  %p1177_p1 = pnand %p1176_p0, %p1170_p11 }
 0x27c   :  { %978 = vmatpush3.bf16.msra.mxu0 %v1051_v46  ;;  %998 = vmatpush3.bf16.msra.mxu1 %v1052_v47 }
 0x27d   :  { %979 = vmatprep.subr.bf16.mxu0 %v1208_v1  ;;  %999 = vmatprep.subr.bf16.mxu1 %v1208_v1 }
 0x280   :  { %980 = vmatpush3.bf16.msra.mxu0 %v1053_v48  ;;  %1000 = vmatpush3.bf16.msra.mxu1 %v1054_v49 }
 0x281   :  { %981 = vmatprep.subr.bf16.mxu0 %v1208_v1  ;;  %1001 = vmatprep.subr.bf16.mxu1 %v1208_v1 }
 0x284   :  { %982 = vmatpush3.bf16.msra.mxu0 %v1055_v50  ;;  %1002 = vmatpush3.bf16.msra.mxu1 %v1056_v51 }
 0x285   :  { %983 = vmatprep.subr.bf16.mxu0 %v1208_v1  ;;  %1003 = vmatprep.subr.bf16.mxu1 %v1208_v1 }
 0x288   :  { %984 = vmatpush3.bf16.msra.mxu0 %v1057_v52  ;;  %1004 = vmatpush3.bf16.msra.mxu1 %v1058_v53 }
 0x289   :  { %985 = vmatprep.subr.bf16.mxu0 %v1208_v1  ;;  %1005 = vmatprep.subr.bf16.mxu1 %v1208_v1 }
 0x28c   :  { %986 = vmatpush3.bf16.msra.mxu0 %v1059_v54  ;;  %1006 = vmatpush3.bf16.msra.mxu1 %v1060_v55 }
 0x28d   :  { %987 = vmatprep.subr.bf16.mxu0 %v1208_v1  ;;  %1007 = vmatprep.subr.bf16.mxu1 %v1208_v1  ;;  %v779_v1 = vld [vmem:[%s1442_s5 + $0x8] sm:$0xff] }
 0x290   :  { %988 = vmatpush3.bf16.msra.mxu0 %v1061_v56  ;;  %1008 = vmatpush3.bf16.msra.mxu1 %v1062_v59 }
 0x293   :  { %990 = vmatmul.mubr.bf16.vlgmr.msra.gmra.mrb[0].mxu0 %v583_v62  ;;  %1010 = vmatmul.mubr.bf16.vlgmr.msra.gmra.mrb[0].mxu1 %v564_v63 }
 0x366   :  { %v682_v0 = vpop.f32.mrb[0].mxu0  ;;  %v771_v2 = vpop.f32.mrb[0].mxu1 }
 0x367   :  { %v991_v4 = vpop.f32.mrb[1].mxu0  ;;  %v772_v5 = vadd.f32 %v771_v2, %v682_v0  ;;  %v1011_v6 = vpop.f32.mrb[1].mxu1 }
 0x368   :  { %v685_v7 = vpop.f32.mrb[2].mxu0  ;;  %v774_v8 = vpop.f32.mrb[2].mxu1 }
 0x369   :  { %v992_v9 = vpop.f32.mrb[3].mxu0  ;;  %v780_v10 = vadd.f32 %v778_v3, %v772_v5  ;;  %v775_v11 = vadd.f32 %v774_v8, %v685_v7  ;;  %v1012_v12 = vpop.f32.mrb[3].mxu1 }
 0x36b   :  { %1063 = vtanh.f32 %v780_v10  ;;  %v781_v13 = vadd.f32 %v779_v1, %v775_v11 }
 0x36d   :  { %1065 = vtanh.f32 %v781_v13 }
 0x375   :  { %v1064_v14 = vpop.eup %1063 }
 0x376   :  { %784 = vst [vmem:[#allocation14] sm:$0xff] %v1064_v14 }
 0x377   :  { %v1066_v15 = vpop.eup %1065 }
 0x378   :  { %785 = vst [vmem:[#allocation14 + $0x8] sm:$0xff] %v1066_v15 }
 0x379   :  { %1180 = shalt.err (!%p1177_p1)
}
 0x37a   :  { %s1181_s28 = scalar_lea.hbm %s1445_s8, 256 }
 0x37b   :  { %p1182_p2 = scmp.ne.s32.totalorder %s1445_s8, %s1181_s28  ;;  %p1185_p3 = scmp.lt.u32.totalorder %s1181_s28, %s1445_s8 }
 0x37d   :  { %p1187_p4 = pnand %p1185_p3, %p1182_p2 }
 0x37f   :  { %1190 = shalt.err (!%p1187_p4)
}
 0x380   :  { %s1217_s7 = smov 128   ;;  %s1218_s11 = smov 8  }
 0x381   :  { %797 = dma.vmem_to_hbm [thread:$0]  %s792_s0, 256, %s1445_s8, [#allocation8], %s1217_s7, %s1217_s7, %s1218_s11  }
 0x382   :  { %1199 = dma.done.wait [#allocation8], 256  }
 0x383   :  { %1200 = vsyncadd [#allocation8], 4294967040 }
 0x384   :  { %801 = vsyncpa [#allocation7], 1 }
 0x385   :  { %802 = vsyncpa [#allocation10], 1 }
 0x386   :  { %803 = vsyncpa [#allocation13], 1 }
 0x387   :  { %804 = vsyncpa [#allocation8], 1 }

</bundles_post_ra>
